<compile_context>
chip_gen: v7x
topology: tpu7x:2x2x1
jax: 0.10.0
libtpu: 0.0.40
codegen_flags: <defaults>
</compile_context>

<pallas_src>
import functools

import numpy as np

import jax
import jax.numpy as jnp
from jax.experimental import pallas as pl
from jax.experimental.pallas import tpu as pltpu


_LANE_DENSE_MAX_C = 64    # unrolled class loop; above this use classes-on-lanes
_MAX_TILE_R = 2048        # sublane rows per lane-dense tile (rows * 128 positions)
_MAX_TILE_M = 4096        # rows per classes-on-lanes tile


def _round_up(v, m):
    return -(-v // m) * m


def _vmem_plan():
    """(tile-working-set budget, vmem_limit_bytes), derived from the chip."""
    cap = 64 * 1024 * 1024                      # conservative default (v7x per-TC)
    try:
        info = pltpu.get_tpu_info()
        cap = int(getattr(info, "vmem_capacity_bytes", cap) or cap)
    except Exception:
        pass
    vmem_limit = min(int(cap * 0.55), 72 * 1024 * 1024)   # leave Mosaic headroom
    budget = int(vmem_limit * 0.6)                         # double-buffers + temps
    return budget, vmem_limit


def _alpha_tuple(alpha, c):
    """Static per-class weights (tuple of floats) or None. alpha is fixed at
    module construction time in the torch module, so baking it is faithful."""
    if alpha is None:
        return None
    if isinstance(alpha, (float, int)) and not isinstance(alpha, bool):
        if c != 2:
            raise ValueError("scalar alpha implies binary classification (C == 2)")
        return (float(alpha), 1.0 - float(alpha))
    a = np.asarray(alpha, dtype=np.float32).reshape(-1)
    if a.shape[0] != c:
        raise ValueError(f"alpha has {a.shape[0]} entries, expected C={c}")
    return tuple(float(v) for v in a)


def _focal_factor(logpt, pt, gamma):
    """loss = -(1 - pt)**gamma * logpt with gamma kept off the EUP when integer."""
    if gamma == 0:
        return -logpt
    omp = 1.0 - pt
    if gamma == 1:
        f = omp
    elif gamma == 2:
        f = omp * omp
    elif isinstance(gamma, int) or float(gamma).is_integer():
        f = omp ** int(gamma)          # integer_pow on the VPU
    else:
        f = omp ** float(gamma)        # float gamma -> exp/log on the EUP
    return -(f * logpt)


# ----------------------------- tile picking ---------------------------------


def _pick_tile_r(r_total, c, itemsize, n_batch, budget):
    """Sublane rows per lane-dense tile; None if the layout does not fit VMEM."""
    # per sublane row: double-buffered logits + targets, ~10 f32 temp slabs.
    per_row = 128 * (2 * c * itemsize + 2 * 4 + 10 * 4)
    max_rows = budget // per_row
    if max_rows < min(8, r_total):
        return None
    if r_total <= max_rows and not (n_batch == 1 and r_total > 8):
        return r_total                                   # full dim: always legal
    if r_total <= max_rows:
        # n_batch == 1: force >= 2 grid steps so both v7x TensorCores get work.
        half = _round_up(-(-r_total // 2), 8)
        return max(8, min(half, (max_rows // 8) * 8, _MAX_TILE_R))
    return max(8, min((max_rows // 8) * 8, _MAX_TILE_R))


def _pick_tile_m(m_total, c, itemsize, budget):
    """Rows per (tile_m, C) tile for the classes-on-lanes fallback."""
    c_pad = _round_up(c, 128)
    per_row = 2 * c_pad * itemsize + 2 * 128 * 4 + 6 * c_pad * 4
    max_rows = max(8, budget // per_row)
    if m_total <= max_rows:
        if m_total > 8:                                  # >= 2 grid steps (v7x)
            half = _round_up(-(-m_total // 2), 8)
            return max(8, min(half, (max_rows // 8) * 8, _MAX_TILE_M))
        return m_total
    return max(8, min((max_rows // 8) * 8, _MAX_TILE_M))


# ------------------------------- kernels -------------------------------------


def _focal_lane_kernel(x_ref, t_ref, o_ref, *, gamma, c, hw, tile_r, need_mask,
                       alpha):
    """Lane-dense layout: block (1, C, tile_r, 128); every lane/sublane is a
    spatial position, the class reduction is an unrolled VPU max/add over C."""
    t = t_ref[0, 0]                                       # (tile_r, 128) int32

    # class-axis max via unrolled elementwise maxima (no sublane reduce).
    mx = x_ref[0, 0].astype(jnp.float32)
    for ci in range(1, c):
        mx = jnp.maximum(mx, x_ref[0, ci].astype(jnp.float32))

    # second pass: exp-sum, target logit and (optionally) per-class alpha.
    esum = jnp.zeros_like(mx)
    zt = jnp.zeros_like(mx)
    at = jnp.zeros_like(mx) if alpha is not None else None
    for ci in range(c):
        z = x_ref[0, ci].astype(jnp.float32) - mx
        esum = esum + jnp.exp(z)
        hit = t == ci
        zt = jnp.where(hit, z, zt)
        if alpha is not None:
            at = jnp.where(hit, alpha[ci], at)            # baked constant splat

    logpt = zt - jnp.log(esum)
    pt = jnp.exp(logpt)
    if alpha is not None:
        logpt = logpt * at
    loss = _focal_factor(logpt, pt, gamma)                # (tile_r, 128)

    def _store(v):
        # reduce only over sublanes; keep the partial lane-dense (1,1,1,128).
        o_ref[...] = jnp.sum(v, axis=0).reshape(1, 1, 1, 128)

    if need_mask:
        j = pl.program_id(1)
        is_last = j == pl.num_programs(1) - 1

        @pl.when(is_last)
        def _():
            row = jax.lax.broadcasted_iota(jnp.int32, loss.shape, 0)
            lane = jax.lax.broadcasted_iota(jnp.int32, loss.shape, 1)
            pos = (j * tile_r + row) * 128 + lane
            _store(jnp.where(pos < hw, loss, 0.0))

        @pl.when(jnp.logical_not(is_last))
        def _():
            _store(loss)
    else:
        _store(loss)


def _focal_rows_kernel(*refs, gamma, c, m_rows, tile_m, need_mask, has_alpha):
    """Classes-on-lanes fallback (large C): block (tile_m, C)."""
    if has_alpha:
        x_ref, t_ref, a_ref, o_ref = refs
    else:
        x_ref, t_ref, o_ref = refs
        a_ref = None

    x = x_ref[...].astype(jnp.float32)                    # (tm, C)
    t = t_ref[...]                                        # (tm, 1)

    mx = jnp.max(x, axis=-1, keepdims=True)
    z = x - mx
    lse = jnp.log(jnp.sum(jnp.exp(z), axis=-1, keepdims=True))

    cls = jax.lax.broadcasted_iota(jnp.int32, x.shape, 1)
    onehot = cls == t
    zt = jnp.sum(jnp.where(onehot, z, 0.0), axis=-1, keepdims=True)
    logpt = zt - lse
    pt = jnp.exp(logpt)
    if has_alpha:
        a = a_ref[...].astype(jnp.float32)                # (1, C)
        at = jnp.sum(jnp.where(onehot, a, 0.0), axis=-1, keepdims=True)
        logpt = logpt * at
    loss = _focal_factor(logpt, pt, gamma)                # (tm, 1)

    def _store(v):
        o_ref[...] = jnp.sum(v).reshape(1, 1, 1)

    if need_mask:
        i = pl.program_id(0)
        is_last = i == pl.num_programs(0) - 1

        @pl.when(is_last)
        def _():
            row = jax.lax.broadcasted_iota(jnp.int32, loss.shape, 0)
            _store(jnp.where(i * tile_m + row < m_rows, loss, 0.0))

        @pl.when(jnp.logical_not(is_last))
        def _():
            _store(loss)
    else:
        _store(loss)


# ------------------------------- runners --------------------------------------


def _lane_dense_sum(x3, t2, alpha_t, gamma, tile_r, vmem_limit):
    """x3: (n, C, hw) logits, t2: (n, hw) int32 targets -> total loss (f32)."""
    n, c, hw = (int(s) for s in x3.shape)
    hw_pad = _round_up(hw, 128)
    if hw_pad != hw:
        x3 = jnp.pad(x3, ((0, 0), (0, 0), (0, hw_pad - hw)))
        t2 = jnp.pad(t2, ((0, 0), (0, hw_pad - hw)))
    r_total = hw_pad // 128
    x4 = x3.reshape(n, c, r_total, 128)
    t4 = t2.reshape(n, 1, r_total, 128)

    grid_r = pl.cdiv(r_total, tile_r)
    need_mask = hw < grid_r * tile_r * 128

    kernel = functools.partial(_focal_lane_kernel, gamma=gamma, c=c, hw=hw,
                               tile_r=tile_r, need_mask=need_mask, alpha=alpha_t)
    partials = pl.pallas_call(
        kernel,
        out_shape=jax.ShapeDtypeStruct((n, grid_r, 1, 128), jnp.float32),
        grid_spec=pltpu.PrefetchScalarGridSpec(
            num_scalar_prefetch=0,
            grid=(n, grid_r),
            in_specs=[
                # NOTE: on v5e, pipeline_mode=pl.Buffered(3) here can hide
                # residual DMA if profiling shows exposed copies.
                pl.BlockSpec((1, c, tile_r, 128), lambda i, j: (i, 0, j, 0)),
                pl.BlockSpec((1, 1, tile_r, 128), lambda i, j: (i, 0, j, 0)),
            ],
            out_specs=pl.BlockSpec((1, 1, 1, 128), lambda i, j: (i, j, 0, 0)),
        ),
        compiler_params=pltpu.CompilerParams(
            dimension_semantics=("parallel", "parallel"),
            vmem_limit_bytes=vmem_limit,
        ),
    )(x4, t4)
    return jnp.sum(partials)


def _rows_sum(x2, t1, alpha_t, gamma, vmem_limit, budget):
    """x2: (M, C) logits, t1: (M, 1) int32 targets -> total loss (f32)."""
    m, c = int(x2.shape[0]), int(x2.shape[1])
    itemsize = jnp.dtype(x2.dtype).itemsize
    tile_m = _pick_tile_m(m, c, itemsize, budget)
    grid_m = pl.cdiv(m, tile_m)
    need_mask = (m % tile_m) != 0
    has_alpha = alpha_t is not None

    inputs = [x2, t1]
    in_specs = [
        pl.BlockSpec((tile_m, c), lambda i: (i, 0)),
        pl.BlockSpec((tile_m, 1), lambda i: (i, 0)),
    ]
    if has_alpha:
        inputs.append(jnp.asarray(alpha_t, jnp.float32).reshape(1, c))
        in_specs.append(pl.BlockSpec((1, c), lambda i: (0, 0)))

    kernel = functools.partial(_focal_rows_kernel, gamma=gamma, c=c, m_rows=m,
                               tile_m=tile_m, need_mask=need_mask,
                               has_alpha=has_alpha)
    partials = pl.pallas_call(
        kernel,
        out_shape=jax.ShapeDtypeStruct((grid_m, 1, 1), jnp.float32),
        grid_spec=pltpu.PrefetchScalarGridSpec(
            num_scalar_prefetch=0,
            grid=(grid_m,),
            in_specs=in_specs,
            out_specs=pl.BlockSpec((1, 1, 1), lambda i: (i, 0, 0)),
        ),
        compiler_params=pltpu.CompilerParams(
            dimension_semantics=("parallel",),
            vmem_limit_bytes=vmem_limit,
        ),
    )(*inputs)
    return jnp.sum(partials)


# ------------------------------- wrapper --------------------------------------


def focal_loss(x, target, *, gamma=0, alpha=None, size_average=True):
    """Pallas FocalLoss forward. x: (N, C) or (N, C, *spatial); target: ints."""
    x = jnp.asarray(x)
    target = jnp.asarray(target)
    itemsize = jnp.dtype(x.dtype).itemsize
    budget, vmem_limit = _vmem_plan()

    if x.ndim > 2:
        n, c = int(x.shape[0]), int(x.shape[1])
        hw = 1
        for s in x.shape[2:]:
            hw *= int(s)
        x3 = x.reshape(n, c, hw)
    else:
        n, c = 1, int(x.shape[1])
        hw = int(x.shape[0])
        x3 = None
    m_total = n * hw
    alpha_t = _alpha_tuple(alpha, c)

    tile_r = None
    if c <= _LANE_DENSE_MAX_C:
        tile_r = _pick_tile_r(pl.cdiv(hw, 128), c, itemsize, n, budget)

    if tile_r is not None:
        if x3 is None:
            x3 = x.T.reshape(1, c, hw)          # (M, C) -> (1, C, M): lane-dense
        t2 = target.reshape(n, hw).astype(jnp.int32)
        total = _lane_dense_sum(x3, t2, alpha_t, gamma, tile_r, vmem_limit)
    else:
        # Large-C fallback: flatten exactly like the torch module and put the
        # class axis on lanes (dense for C >= ~128).
        if x.ndim > 2:
            x2 = jnp.transpose(x3, (0, 2, 1)).reshape(-1, c)
        else:
            x2 = x
        t1 = target.reshape(-1, 1).astype(jnp.int32)
        total = _rows_sum(x2, t1, alpha_t, gamma, vmem_limit, budget)

    return total / m_total if size_average else total


# --------------------------- pure-JAX reference --------------------------------


def focal_loss_ref(x, target, *, gamma=0, alpha=None, size_average=True):
    """Pure-JAX reference mirroring the PyTorch module."""
    x = jnp.asarray(x)
    if x.ndim > 2:
        n, c = x.shape[0], x.shape[1]
        x = jnp.transpose(x.reshape(n, c, -1), (0, 2, 1)).reshape(-1, c)
    t = jnp.asarray(target).reshape(-1)
    logp = jax.nn.log_softmax(x.astype(jnp.float32), axis=-1)
    logpt = jnp.take_along_axis(logp, t[:, None], axis=1)[:, 0]
    pt = jnp.exp(logpt)
    if alpha is not None:
        a = jnp.asarray(_alpha_tuple(alpha, int(x.shape[-1])), jnp.float32)
        logpt = logpt * a[t]
    factor = jnp.ones_like(pt) if gamma == 0 else (1.0 - pt) ** gamma
    loss = -factor * logpt
    return jnp.mean(loss) if size_average else jnp.sum(loss)


if __name__ == "__main__":
    key = jax.random.PRNGKey(0)
    k1, k2, k3, k4, k5, k6 = jax.random.split(key, 6)

    checks = []

    # 1) NCHW f32, small C -> lane-dense layout, no ragged edge (HW == 256).
    x1 = jax.random.normal(k1, (2, 4, 16, 16), jnp.float32)
    t1 = jax.random.randint(k2, (2, 16, 16), 0, 4)
    a1 = [0.1, 0.2, 0.3, 0.4]
    checks.append((focal_loss(x1, t1, gamma=2, alpha=a1, size_average=True),
                   focal_loss_ref(x1, t1, gamma=2, alpha=a1, size_average=True),
                   1e-5))

    # 2) ragged spatial extent (12*12 = 144 -> padded to 256), alpha=None, sum.
    x2 = jax.random.normal(k3, (2, 4, 12, 12), jnp.float32)
    t2 = jax.random.randint(k4, (2, 12, 12), 0, 4)
    checks.append((focal_loss(x2, t2, gamma=2, alpha=None, size_average=False),
                   focal_loss_ref(x2, t2, gamma=2, alpha=None, size_average=False),
                   1e-4))

    # 3) plain 2-D input, small C -> transposed into the lane-dense layout.
    x3 = jax.random.normal(k5, (50, 6), jnp.float32)
    t3 = jax.random.randint(k6, (50,), 0, 6)
    a3 = [0.1, 0.2, 0.1, 0.2, 0.2, 0.2]
    checks.append((focal_loss(x3, t3, gamma=0, alpha=a3, size_average=True),
                   focal_loss_ref(x3, t3, gamma=0, alpha=a3, size_average=True),
                   1e-5))

    # 4) bf16 logits end-to-end (upcast to f32 inside the kernel).
    x4 = x1.astype(jnp.bfloat16)
    checks.append((focal_loss(x4, t1, gamma=2, alpha=a1, size_average=True),
                   focal_loss_ref(x4, t1, gamma=2, alpha=a1, size_average=True),
                   1e-4))

    # 5) n == 1: forces >= 2 grid steps on the spatial axis + last-tile masking.
    x5 = jax.random.normal(k1, (1, 3, 40, 40), jnp.float32)
    t5 = jax.random.randint(k2, (1, 40, 40), 0, 3)
    checks.append((focal_loss(x5, t5, gamma=2, alpha=None, size_average=True),
                   focal_loss_ref(x5, t5, gamma=2, alpha=None, size_average=True),
                   1e-5))

    # 6) large-C 2-D input -> classes-on-lanes fallback path.
    x6 = jax.random.normal(k3, (40, 160), jnp.float32)
    t6 = jax.random.randint(k4, (40,), 0, 160)
    a6 = [float(v) for v in np.linspace(0.5, 1.5, 160)]
    checks.append((focal_loss(x6, t6, gamma=2, alpha=a6, size_average=True),
                   focal_loss_ref(x6, t6, gamma=2, alpha=a6, size_average=True),
                   1e-5))

    for idx, (out, ref, tol) in enumerate(checks, 1):
        out = jax.block_until_ready(out)
        assert jnp.allclose(out, ref, rtol=tol, atol=tol), (idx, out, ref)

    print("KERNEL_OK")
</pallas_src>

<mosaic_0001>
module attributes {stable_mosaic.version = 11 : i64} {
  func.func @_focal_lane_kernel(%arg0: i32, %arg1: i32, %arg2: memref<1x4x2x128xf32, #tpu.memory_space<vmem>>, %arg3: memref<1x1x2x128xi32, #tpu.memory_space<vmem>>, %arg4: memref<1x1x1x128xf32, #tpu.memory_space<vmem>>) attributes {dimension_semantics = [#tpu.dimension_semantics<parallel>, #tpu.dimension_semantics<parallel>], iteration_bounds = array<i64: 2, 1>, scalar_prefetch = 0 : i64, scratch_operands = 0 : i64, tpu.core_type = #tpu.core_type<tc>, window_params = [{transform_indices = @transform_0, window_bounds = array<i64: 1, 4, 2, 128>}, {transform_indices = @transform_1, window_bounds = array<i64: 1, 1, 2, 128>}, {transform_indices = @transform_2, window_bounds = array<i64: 1, 1, 1, 128>}]} {
    %c0 = arith.constant 0 : index
    %c0_0 = arith.constant 0 : index
    %c0_1 = arith.constant 0 : index
    %c0_2 = arith.constant 0 : index
    %0 = vector.load %arg3[%c0, %c0_0, %c0_1, %c0_2] : memref<1x1x2x128xi32, #tpu.memory_space<vmem>>, vector<1x1x2x128xi32>
    %1 = vector.shape_cast %0 : vector<1x1x2x128xi32> to vector<2x128xi32>
    %c0_3 = arith.constant 0 : index
    %c0_4 = arith.constant 0 : index
    %c0_5 = arith.constant 0 : index
    %c0_6 = arith.constant 0 : index
    %2 = vector.load %arg2[%c0_3, %c0_4, %c0_5, %c0_6] : memref<1x4x2x128xf32, #tpu.memory_space<vmem>>, vector<1x1x2x128xf32>
    %3 = vector.shape_cast %2 : vector<1x1x2x128xf32> to vector<2x128xf32>
    %c0_7 = arith.constant 0 : index
    %c1 = arith.constant 1 : index
    %c0_8 = arith.constant 0 : index
    %c0_9 = arith.constant 0 : index
    %4 = vector.load %arg2[%c0_7, %c1, %c0_8, %c0_9] : memref<1x4x2x128xf32, #tpu.memory_space<vmem>>, vector<1x1x2x128xf32>
    %5 = vector.shape_cast %4 : vector<1x1x2x128xf32> to vector<2x128xf32>
    %6 = arith.maximumf %3, %5 : vector<2x128xf32>
    %c0_10 = arith.constant 0 : index
    %c2 = arith.constant 2 : index
    %c0_11 = arith.constant 0 : index
    %c0_12 = arith.constant 0 : index
    %7 = vector.load %arg2[%c0_10, %c2, %c0_11, %c0_12] : memref<1x4x2x128xf32, #tpu.memory_space<vmem>>, vector<1x1x2x128xf32>
    %8 = vector.shape_cast %7 : vector<1x1x2x128xf32> to vector<2x128xf32>
    %9 = arith.maximumf %6, %8 : vector<2x128xf32>
    %c0_13 = arith.constant 0 : index
    %c3 = arith.constant 3 : index
    %c0_14 = arith.constant 0 : index
    %c0_15 = arith.constant 0 : index
    %10 = vector.load %arg2[%c0_13, %c3, %c0_14, %c0_15] : memref<1x4x2x128xf32, #tpu.memory_space<vmem>>, vector<1x1x2x128xf32>
    %11 = vector.shape_cast %10 : vector<1x1x2x128xf32> to vector<2x128xf32>
    %12 = arith.maximumf %9, %11 : vector<2x128xf32>
    %cst = arith.constant 0.000000e+00 : f32
    %13 = vector.broadcast %cst : f32 to vector<2x128xf32>
    %cst_16 = arith.constant 0.000000e+00 : f32
    %14 = vector.broadcast %cst_16 : f32 to vector<2x128xf32>
    %cst_17 = arith.constant 0.000000e+00 : f32
    %15 = vector.broadcast %cst_17 : f32 to vector<2x128xf32>
    %c0_18 = arith.constant 0 : index
    %c0_19 = arith.constant 0 : index
    %c0_20 = arith.constant 0 : index
    %c0_21 = arith.constant 0 : index
    %16 = vector.load %arg2[%c0_18, %c0_19, %c0_20, %c0_21] : memref<1x4x2x128xf32, #tpu.memory_space<vmem>>, vector<1x1x2x128xf32>
    %17 = vector.shape_cast %16 : vector<1x1x2x128xf32> to vector<2x128xf32>
    %18 = arith.subf %17, %12 : vector<2x128xf32>
    %19 = math.exp %18 : vector<2x128xf32>
    %20 = arith.addf %13, %19 : vector<2x128xf32>
    %c0_i32 = arith.constant 0 : i32
    %21 = vector.broadcast %c0_i32 : i32 to vector<2x128xi32>
    %22 = arith.cmpi eq, %1, %21 : vector<2x128xi32>
    %23 = arith.select %22, %18, %14 : vector<2x128xi1>, vector<2x128xf32>
    %cst_22 = arith.constant 1.000000e-01 : f32
    %24 = vector.broadcast %cst_22 : f32 to vector<2x128xf32>
    %25 = arith.select %22, %24, %15 : vector<2x128xi1>, vector<2x128xf32>
    %c0_23 = arith.constant 0 : index
    %c1_24 = arith.constant 1 : index
    %c0_25 = arith.constant 0 : index
    %c0_26 = arith.constant 0 : index
    %26 = vector.load %arg2[%c0_23, %c1_24, %c0_25, %c0_26] : memref<1x4x2x128xf32, #tpu.memory_space<vmem>>, vector<1x1x2x128xf32>
    %27 = vector.shape_cast %26 : vector<1x1x2x128xf32> to vector<2x128xf32>
    %28 = arith.subf %27, %12 : vector<2x128xf32>
    %29 = math.exp %28 : vector<2x128xf32>
    %30 = arith.addf %20, %29 : vector<2x128xf32>
    %c1_i32 = arith.constant 1 : i32
    %31 = vector.broadcast %c1_i32 : i32 to vector<2x128xi32>
    %32 = arith.cmpi eq, %1, %31 : vector<2x128xi32>
    %33 = arith.select %32, %28, %23 : vector<2x128xi1>, vector<2x128xf32>
    %cst_27 = arith.constant 2.000000e-01 : f32
    %34 = vector.broadcast %cst_27 : f32 to vector<2x128xf32>
    %35 = arith.select %32, %34, %25 : vector<2x128xi1>, vector<2x128xf32>
    %c0_28 = arith.constant 0 : index
    %c2_29 = arith.constant 2 : index
    %c0_30 = arith.constant 0 : index
    %c0_31 = arith.constant 0 : index
    %36 = vector.load %arg2[%c0_28, %c2_29, %c0_30, %c0_31] : memref<1x4x2x128xf32, #tpu.memory_space<vmem>>, vector<1x1x2x128xf32>
    %37 = vector.shape_cast %36 : vector<1x1x2x128xf32> to vector<2x128xf32>
    %38 = arith.subf %37, %12 : vector<2x128xf32>
    %39 = math.exp %38 : vector<2x128xf32>
    %40 = arith.addf %30, %39 : vector<2x128xf32>
    %c2_i32 = arith.constant 2 : i32
    %41 = vector.broadcast %c2_i32 : i32 to vector<2x128xi32>
    %42 = arith.cmpi eq, %1, %41 : vector<2x128xi32>
    %43 = arith.select %42, %38, %33 : vector<2x128xi1>, vector<2x128xf32>
    %cst_32 = arith.constant 3.000000e-01 : f32
    %44 = vector.broadcast %cst_32 : f32 to vector<2x128xf32>
    %45 = arith.select %42, %44, %35 : vector<2x128xi1>, vector<2x128xf32>
    %c0_33 = arith.constant 0 : index
    %c3_34 = arith.constant 3 : index
    %c0_35 = arith.constant 0 : index
    %c0_36 = arith.constant 0 : index
    %46 = vector.load %arg2[%c0_33, %c3_34, %c0_35, %c0_36] : memref<1x4x2x128xf32, #tpu.memory_space<vmem>>, vector<1x1x2x128xf32>
    %47 = vector.shape_cast %46 : vector<1x1x2x128xf32> to vector<2x128xf32>
    %48 = arith.subf %47, %12 : vector<2x128xf32>
    %49 = math.exp %48 : vector<2x128xf32>
    %50 = arith.addf %40, %49 : vector<2x128xf32>
    %c3_i32 = arith.constant 3 : i32
    %51 = vector.broadcast %c3_i32 : i32 to vector<2x128xi32>
    %52 = arith.cmpi eq, %1, %51 : vector<2x128xi32>
    %53 = arith.select %52, %48, %43 : vector<2x128xi1>, vector<2x128xf32>
    %cst_37 = arith.constant 4.000000e-01 : f32
    %54 = vector.broadcast %cst_37 : f32 to vector<2x128xf32>
    %55 = arith.select %52, %54, %45 : vector<2x128xi1>, vector<2x128xf32>
    %56 = math.log %50 : vector<2x128xf32>
    %57 = arith.subf %53, %56 : vector<2x128xf32>
    %58 = math.exp %57 : vector<2x128xf32>
    %59 = arith.mulf %57, %55 : vector<2x128xf32>
    %cst_38 = arith.constant 1.000000e+00 : f32
    %60 = vector.broadcast %cst_38 : f32 to vector<2x128xf32>
    %61 = arith.subf %60, %58 : vector<2x128xf32>
    %62 = arith.mulf %61, %61 : vector<2x128xf32>
    %63 = arith.mulf %62, %59 : vector<2x128xf32>
    %cst_39 = arith.constant 0.000000e+00 : f32
    %64 = vector.broadcast %cst_39 : f32 to vector<2x128xf32>
    %65 = arith.subf %64, %63 : vector<2x128xf32>
    %cst_40 = arith.constant dense<0.000000e+00> : vector<128xf32>
    %66 = vector.multi_reduction <add>, %65, %cst_40 [0] : vector<2x128xf32> to vector<128xf32>
    %67 = vector.shape_cast %66 : vector<128xf32> to vector<1x1x1x128xf32>
    %c0_41 = arith.constant 0 : index
    %c0_42 = arith.constant 0 : index
    %c0_43 = arith.constant 0 : index
    %c0_44 = arith.constant 0 : index
    %68 = vector.load %arg4[%c0_41, %c0_42, %c0_43, %c0_44] : memref<1x1x1x128xf32, #tpu.memory_space<vmem>>, vector<1x1x1x128xf32>
    tpu.vector_store %arg4[%c0_41, %c0_42, %c0_43, %c0_44], %67 {strides = array<i32>} : memref<1x1x1x128xf32, #tpu.memory_space<vmem>>, vector<1x1x1x128xf32>,
    return
  }
  func.func @transform_0(%arg0: i32, %arg1: i32) -> (i32, i32, i32, i32) {
    %c0_i32 = arith.constant 0 : i32
    %c0_i32_0 = arith.constant 0 : i32
    %c0_i32_1 = arith.constant 0 : i32
    return %arg0, %c0_i32, %arg1, %c0_i32_0 : i32, i32, i32, i32
  }
  func.func @transform_1(%arg0: i32, %arg1: i32) -> (i32, i32, i32, i32) {
    %c0_i32 = arith.constant 0 : i32
    %c0_i32_0 = arith.constant 0 : i32
    %c0_i32_1 = arith.constant 0 : i32
    return %arg0, %c0_i32, %arg1, %c0_i32_0 : i32, i32, i32, i32
  }
  func.func @transform_2(%arg0: i32, %arg1: i32) -> (i32, i32, i32, i32) {
    %c0_i32 = arith.constant 0 : i32
    %c0_i32_0 = arith.constant 0 : i32
    %c0_i32_1 = arith.constant 0 : i32
    return %arg0, %arg1, %c0_i32, %c0_i32_0 : i32, i32, i32, i32
  }
}

</mosaic_0001>

<bundles_post_ra>
// kernel: tpu_custom_call.1
= control target key start
LH: loop header
LB: loop body
LE: loop exit
PB: predicated region body
PF: predicated region fallthrough
CT: control target
= control target key end

     0   :  { %7 = vsyncpa [#allocation3], 0  ;;  %s877_s0 = inlined_call_operand.hbm [shape: f32[2,4,2,128], index: 0, kind: input, shape index: {}]   ;;  %s878_s1 = inlined_call_operand.hbm [shape: s32[2,1,2,128], index: 1, kind: input, shape index: {}]   ;;  %s879_s2 = inlined_call_operand.hbm [shape: f32[2,1,1,128], index: 2, kind: output, shape index: {}]  }
   0x1   :  { %9 = vsyncpa [#allocation3 + $0x1], 0 }
   0x2   :  { %10 = vsyncpa [#allocation6], 0 }
   0x3   :  { %12 = vsyncpa [#allocation6 + $0x1], 0 }
   0x4   :  { %13 = vsyncpa [#allocation4], 0 }
   0x5   :  { %15 = vsyncpa [#allocation4 + $0x1], 0  ;;  %s661_s9 = smov 0   ;;  %s663_s10 = smov 0  }
   0x6   :  { %s665_s11 = smov 0   ;;  %s667_s12 = smov 0  }
   0x7   :  { %s669_s13 = smov 0   ;;  %s671_s14 = smov 0  }
   0x8 LB: > { %s391_s15 = sadd.s32 4294967295, %s638_s14   ;;  %s392_s16 = sadd.s32 4294967294, %s638_s14   ;;  %s638_s14 = sphi %s671_s14, %s21_s14   ;;  %s634_s13 = sphi %s669_s13, %s898_s13   ;;  %s630_s12 = sphi %s667_s12, %s897_s12   ;;  %s626_s11 = sphi %s665_s11, %s896_s11   ;;  %s622_s10 = sphi %s663_s10, %s895_s10   ;;  %s618_s9 = sphi %s661_s9, %s894_s9  }
   0x9   : > { %s33_s17 = sadd.s32 1, %s634_s13  ;;  %s42_s18 = sadd.s32 1, %s626_s11 }
   0xa   : > { %p35_p0 = scmp.ge.s32.totalorder %s33_s17, 2  ;;  %p49_p1 = scmp.ne.s32.totalorder %s626_s11, %s622_s10 }
   0xb   : > { %p50_p2 = scmp.eq.s32.totalorder %s638_s14, 0  ;;  %p55_p3 = scmp.ne.s32.totalorder %s622_s10, %s618_s9 }
   0xc   : > { %s900_s17 = smov (%p35_p0, %s33_s17), 0  ;;  %p56_p5 = scmp.eq.s32.totalorder %s391_s15, 0 }
   0xd   : > { %p702_p4 = por %p50_p2, %p49_p1  ;;  %s37_s20 = ssub.s32 %s634_s13, %s900_s17 }
   0xe   : > { %p109_p6 = scmp.eq.s32.totalorder %s391_s15, 1  ;;  %p40_p7 = scmp.eq.s32.totalorder %s37_s20, 0 }
   0xf   : > { %p708_p8 = por %p56_p5, %p55_p3  ;;  %p115_p10 = scmp.eq.s32.totalorder %s392_s16, 1 }
  0x10   : > { %p712_p9 = por %p109_p6, %p49_p1  ;;  %p427_p13 = scmp.lt.s32.totalorder %s638_s14, 2 }
  0x11   : > { %s883_s21 = scalar_select %p708_p8, 1, 0 }
  0x12   : > { %s884_s22 = scalar_select %p712_p9, 1, 0 }
  0x13   : > { %s717_s23 = scalar_select %p40_p7, %s626_s11, %s42_s18  }
  0x14   : > { %p719_p11 = por %p115_p10, %p55_p3  ;;  %s726_s25 = sand.u32 1, %s626_s11  }
  0x15   : > { %s395_s26 = sshll.u32 %s726_s25, 3  ;;  %s409_s27 = sshll.u32 %s634_s13, 7 }
  0x16   : > { %s885_s24 = scalar_select %p719_p11, 1, 0 }
  0x17   : > { %s733_s30 = scalar_lea.hbm %s877_s0, %s409_s27  ;;  %s139_s3 = scalar_lea.vmem [#allocation2], %s395_s26 }
  0x18   : > { %s147_s4 = sshll.u32 %s139_s3, 4  ;;  %p739_p0 = pnand %p427_p13, %p702_p4  ;;  %s735_s4 = int_to_ptr.vmem [resolvable:$true] %s147_s4 }
  0x19   : > { %s136_s6 = scalar_lea.sflag [#allocation3], %s726_s25  ;;  %s492_s7 = scalar_lea.hbm %s733_s30, 128 }
  0x1a   : > { %p493_p2 = scmp.ne.s32.totalorder %s733_s30, %s492_s7  ;;  %p494_p3 = pneg %p739_p0 }
  0x1b   : > { %s497_s16 = scalar_lea.hbm %s877_s0, 256  ;;  %p498_p4 = scmp.lt.u32.totalorder %s733_s30, %s877_s0 }
  0x1c   : > { %p495_p5 = pnand %p494_p3, %p493_p2  ;;  %p499_p7 = scmp.lt.u32.totalorder %s497_s16, %s492_s7 }
  0x1d   : > { %p501_p13 = scmp.lt.u32.totalorder %s492_s7, %s733_s30 }
  0x1e   : > { %p496_p6 = pneg %p495_p5  ;;  %p500_p10 = por %p499_p7, %p498_p4 }
  0x20   : > { %p502_p12 = por %p501_p13, %p500_p10 }
  0x22   : > { %p503_p1 = pnand %p502_p12, %p496_p6 }
  0x24   : > { %506 = shalt.err (!%p503_p1)
}
  0x25   : > { %s507_s20 = scalar_lea.vmem %s735_s4, 128  ;;  %s640_s26 = smov [#allocation2]  }
  0x26   : > { %p508_p2 = scmp.ne.s32.totalorder %s735_s4, %s507_s20  ;;  %s512_s27 = sshll.u32 %s640_s26, 4  ;;  %s513_s27 = int_to_ptr.vmem [resolvable:$false] %s512_s27 }
  0x27   : > { %s514_s28 = scalar_lea.vmem %s513_s27, 256  ;;  %p515_p9 = scmp.lt.s32.totalorder %s735_s4, %s513_s27 }
  0x28   : > { %p510_p5 = pnand %p508_p2, %p494_p3  ;;  %p516_p4 = scmp.lt.s32.totalorder %s514_s28, %s507_s20 }
  0x2a   : > { %p511_p11 = pneg %p510_p5  ;;  %p517_p7 = por %p516_p4, %p515_p9 }
  0x2c   : > { %p518_p10 = pnand %p517_p7, %p511_p11 }
  0x2e   : > { %521 = shalt.err (!%p518_p10)
}
  0x2f   : > { %s641_s29 = smov 32   ;;  %s642_s3 = smov 2  }
  0x30   : > { %419 = dma.hbm_to_vmem [thread:$0]  (!%p739_p0), %s733_s30, 128, %s735_s4, %s136_s6, %s641_s29, %s641_s29, %s642_s3  }
  0x31   : > { %p174_p12 = scmp.lt.s32.totalorder %s638_s14, 3  ;;  %s398_s7 = sshll.u32 %s726_s25, 1 }
  0x32   : > { %s399_s8 = sshll.u32 %s634_s13, 5  ;;  %p887_p9 = scmp.ge.s32.totalorder %s638_s14, 1 }
  0x33   : > { %s784_s19 = scalar_lea.hbm %s878_s1, %s399_s8  ;;  %s161_s20 = scalar_lea.vmem [#allocation5], %s398_s7 }
  0x34   : > { %p777_p11 = pnand %p887_p9, %p174_p12  ;;  %s169_s26 = sshll.u32 %s161_s20, 4  ;;  %s170_s26 = int_to_ptr.vmem [resolvable:$true] %s169_s26 }
  0x35   : > { %s158_s30 = scalar_lea.sflag [#allocation6], %s726_s25  ;;  %s522_s4 = scalar_lea.hbm %s784_s19, 32 }
  0x36   : > { %s888_s15 = scalar_select %p777_p11, 1, 0 }
  0x37   : > { %p523_p1 = scmp.ne.s32.totalorder %s784_s19, %s522_s4  ;;  %s527_s28 = scalar_lea.hbm %s878_s1, 64 }
  0x38   : > { %p528_p2 = scmp.lt.u32.totalorder %s784_s19, %s878_s1  ;;  %p529_p5 = scmp.lt.u32.totalorder %s527_s28, %s522_s4 }
  0x39   : > { %p525_p6 = pnand %p523_p1, %p494_p3  ;;  %p531_p7 = scmp.lt.u32.totalorder %s522_s4, %s784_s19 }
  0x3a   : > { %p530_p4 = por %p529_p5, %p528_p2 }
  0x3b   : > { %p526_p13 = pneg %p525_p6 }
  0x3c   : > { %p532_p10 = por %p531_p7, %p530_p4 }
  0x3e   : > { %p533_p12 = pnand %p532_p10, %p526_p13 }
  0x40   : > { %536 = shalt.err (!%p533_p12)
}
  0x41   : > { %s537_s25 = scalar_lea.vmem %s170_s26, 32  ;;  %s643_s7 = smov [#allocation5]  }
  0x42   : > { %p538_p9 = scmp.ne.s32.totalorder %s170_s26, %s537_s25  ;;  %s542_s8 = sshll.u32 %s643_s7, 4  ;;  %s543_s8 = int_to_ptr.vmem [resolvable:$false] %s542_s8 }
  0x43   : > { %s544_s16 = scalar_lea.vmem %s543_s8, 64  ;;  %p545_p8 = scmp.lt.s32.totalorder %s170_s26, %s543_s8 }
  0x44   : > { %p540_p1 = pnand %p538_p9, %p494_p3  ;;  %p546_p11 = scmp.lt.s32.totalorder %s544_s16, %s537_s25 }
  0x46   : > { %p541_p6 = pneg %p540_p1  ;;  %p547_p2 = por %p546_p11, %p545_p8 }
  0x48   : > { %p548_p5 = pnand %p547_p2, %p541_p6 }
  0x4a   : > { %551 = shalt.err (!%p548_p5)
}
  0x4b   : > { %422 = dma.hbm_to_vmem [thread:$0]  (!%p739_p0), %s784_s19, 32, %s170_s26, %s158_s30  }
  0x4c   : > { %p889_p13 = scmp.ne.s32.totalorder %s888_s15, 0 }
  0x4d   : > { %s809_s18 = sand.u32 (!%p889_p13), 1, %s622_s10   ;;  %p890_p3 = scmp.ne.s32.totalorder (!%p889_p13), %s883_s21, 0 }
  0x4e   : > { %178 = sbr.rel (%p889_p13) target bundleno = 181 (0xb5), region = 28  ;;  %s401_s20 = sshll.u32 (!%p889_p13), %s809_s18, 3 }
  0x4f   : > { %s181_s4 = scalar_lea.sflag (!%p889_p13), [#allocation3], %s809_s18  ;;  %s184_s6 = scalar_lea.vmem (!%p889_p13), [#allocation2], %s401_s20 }
  0x55   : > { %605 = dma.done.wait (%p890_p3), %s181_s4, 128  }
  0x56   : > { %607 = vsyncadd (%p890_p3), %s181_s4, 4294967168  ;;  %s402_s5 = sshll.u32 %s809_s18, 1  ;;  %s190_s15 = scalar_lea.sflag [#allocation6], %s809_s18 }
  0x57   : > { %s193_s19 = scalar_lea.vmem [#allocation5], %s402_s5 }
  0x58   : > { %609 = dma.done.wait (%p890_p3), %s190_s15, 32  }
  0x59   : > { %611 = vsyncadd (%p890_p3), %s190_s15, 4294967264  ;;  %v219_v0 = vld [vmem:[%s184_s6] sm:$0x3]  ;;  %v403_v1 = vld [vmem:[%s184_s6 + $0x2] sm:$0x3]  ;;  %v644_v31 = vmov 0.0  }
  0x5a   : > { %v222_v2 = vmax.f32 %v219_v0, %v403_v1  ;;  %v404_v3 = vld [vmem:[%s184_s6 + $0x4] sm:$0x3]  ;;  %v405_v4 = vld [vmem:[%s184_s6 + $0x6] sm:$0x3]  ;;  %v218_v20 = vld [vmem:[%s193_s19] sm:$0x3] }
  0x5b   : > { %vm233_vm0 = vcmp.eq.s32.totalorder %v218_v20, 0  ;;  %vm240_vm1 = vcmp.eq.s32.totalorder %v218_v20, 1  ;;  %vm247_vm2 = vcmp.eq.s32.totalorder %v218_v20, 2  ;;  %vm254_vm3 = vcmp.eq.s32.totalorder %v218_v20, 3  ;;  %s217_s21 = scalar_lea.vmem [#allocation7], %s809_s18  ;;  %s406_s30 = sshll.u32 %s630_s12, 4 }
  0x5c   : > { %v225_v5 = vmax.f32 %v222_v2, %v404_v3  ;;  %v235_v32 = vsel %vm233_vm0, 0.1, %v644_v31  ;;  %vm267_vm4 = vcmask 1041408   ;;  %s290_s26 = sshll.u32 %s217_s21, 4  ;;  %s830_s29 = scalar_lea.hbm %s879_s2, %s406_s30  ;;  %s825_s26 = int_to_ptr.vmem [resolvable:$true] %s290_s26 }
  0x5d   : > { %v242_v33 = vsel %vm240_vm1, 0.2, %v235_v32  ;;  %s277_s3 = scalar_lea.sflag [#allocation4], %s809_s18  ;;  %s552_s25 = scalar_lea.vmem %s825_s26, 16 }
  0x5e   : > { %v228_v6 = vmax.f32 %v225_v5, %v405_v4  ;;  %v249_v34 = vsel %vm247_vm2, 0.3, %v242_v33  ;;  %p553_p8 = scmp.ne.s32.totalorder %s825_s26, %s552_s25  ;;  %p891_p0 = scmp.ne.s32.totalorder %s884_s22, 0 }
  0x5f   : > { %v256_v35 = vsel %vm254_vm3, 0.4, %v249_v34  ;;  %s645_s12 = smov [#allocation7]  }
  0x60   : > { %v229_v7 = vsub.f32 %v219_v0, %v228_v6  ;;  %v236_v8 = vsub.f32 %v403_v1, %v228_v6  ;;  %v243_v9 = vsub.f32 %v404_v3, %v228_v6  ;;  %v250_v10 = vsub.f32 %v405_v4, %v228_v6  ;;  %p554_p11 = pnand %p553_p8, %p891_p0  ;;  %s556_s7 = sshll.u32 %s645_s12, 4  ;;  %s557_s7 = int_to_ptr.vmem [resolvable:$false] %s556_s7 }
  0x61   : > { %s558_s8 = scalar_lea.vmem %s557_s7, 32  ;;  %p559_p7 = scmp.lt.s32.totalorder %s825_s26, %s557_s7 }
  0x62   : > { %v230_v11 = vmul.f32 1.442695, %v229_v7  ;;  %v237_v12 = vmul.f32 1.442695, %v236_v8  ;;  %v244_v13 = vmul.f32 1.442695, %v243_v9  ;;  %p555_p4 = pneg %p554_p11  ;;  %p560_p10 = scmp.lt.s32.totalorder %s558_s8, %s552_s25 }
  0x63   : > { %v251_v14 = vmul.f32 1.442695, %v250_v10  ;;  %v234_v23 = vsel %vm233_vm0, %v229_v7, 0.0 }
  0x64   : > { %480 = vpow2.f32 %v230_v11  ;;  %v241_v24 = vsel %vm240_vm1, %v236_v8, %v234_v23  ;;  %p561_p12 = por %p560_p10, %p559_p7 }
  0x65   : > { %482 = vpow2.f32 %v237_v12  ;;  %v248_v25 = vsel %vm247_vm2, %v243_v9, %v241_v24 }
  0x66   : > { %484 = vpow2.f32 %v244_v13  ;;  %v255_v27 = vsel %vm254_vm3, %v250_v10, %v248_v25  ;;  %p562_p9 = pnand %p561_p12, %p555_p4 }
  0x67   : > { %486 = vpow2.f32 %v251_v14 }
  0x6e   : > { %v481_v15 = vpop.eup %480 }
  0x6f   : > { %v483_v16 = vpop.eup %482 }
  0x70   : > { %v485_v17 = vpop.eup %484  ;;  %v239_v18 = vadd.f32 %v483_v16, %v481_v15 }
  0x71   : > { %v487_v19 = vpop.eup %486 }
  0x72   : > { %v246_v21 = vadd.f32 %v485_v17, %v239_v18 }
  0x74   : > { %v253_v22 = vadd.f32 %v487_v19, %v246_v21 }
  0x76   : > { %488 = vlog2.f32 %v253_v22 }
  0x80   : > { %v489_v26 = vpop.eup %488 }
  0x81   : > { %v258_v28 = vmul.f32 0.6931472, %v489_v26 }
  0x83   : > { %v259_v29 = vsub.f32 %v255_v27, %v258_v28 }
  0x85   : > { %v260_v30 = vmul.f32 1.442695, %v259_v29  ;;  %v262_v37 = vmul.f32 %v259_v29, %v256_v35 }
  0x87   : > { %490 = vpow2.f32 %v260_v30 }
  0x91   : > { %v491_v36 = vpop.eup %490 }
  0x92   : > { %v263_v38 = vsub.f32 1.0, %v491_v36 }
  0x94   : > { %v264_v39 = vmul.f32 %v263_v38, %v263_v38 }
  0x96   : > { %v265_v40 = vmul.f32 %v264_v39, %v262_v37 }
  0x98   : > { %v266_v41 = vsub.f32 0.0, %v265_v40 }
  0x9a   : > { %v268_v42 = vsel %vm267_vm4, %v266_v41, 0.0 }
  0x9b   : > { %v269_v43 = vrot.slane %v268_v42, 4 }
  0x9d   : > { %v270_v44 = vadd.f32 %v269_v43, %v268_v42 }
  0x9f   : > { %v271_v45 = vrot.slane %v270_v44, 2 }
  0xa1   : > { %v272_v46 = vadd.f32 %v271_v45, %v270_v44 }
  0xa3   : > { %v273_v47 = vrot.slane %v272_v46, 1 }
  0xa5   : > { %v274_v48 = vadd.f32 %v273_v47, %v272_v46 }
  0xa7   : > { %275 = vst [vmem:[%s217_s21] sm:$0x1] %v274_v48 }
  0xa8   : > { %565 = shalt.err (!%p562_p9)
}
  0xa9   : > { %s566_s16 = scalar_lea.hbm %s830_s29, 16  ;;  %s570_s4 = scalar_lea.hbm %s879_s2, 32 }
  0xaa   : > { %p567_p1 = scmp.ne.s32.totalorder %s830_s29, %s566_s16  ;;  %p571_p5 = scmp.lt.u32.totalorder %s830_s29, %s879_s2 }
  0xab   : > { %p572_p13 = scmp.lt.u32.totalorder %s570_s4, %s566_s16  ;;  %p574_p8 = scmp.lt.u32.totalorder %s566_s16, %s830_s29 }
  0xac   : > { %p568_p6 = pnand %p567_p1, %p891_p0 }
  0xad   : > { %p573_p3 = por %p572_p13, %p571_p5 }
  0xae   : > { %p569_p2 = pneg %p568_p6 }
  0xaf   : > { %p575_p11 = por %p574_p8, %p573_p3 }
  0xb1   : > { %p576_p4 = pnand %p575_p11, %p569_p2 }
  0xb3   : > { %579 = shalt.err (!%p576_p4)
}
  0xb4   : > { %414 = dma.vmem_to_hbm [thread:$0]  (%p891_p0), %s825_s26, 16, %s830_s29, %s277_s3  }
  0xb5 PF: > { %s302_s15 = sand.u32 1, %s618_s9   ;;  %p892_p7 = scmp.ne.s32.totalorder %s885_s24, 0 }
  0xb6   : > { %p893_p10 = scmp.ge.s32.totalorder %s638_s14, 2  ;;  %s303_s19 = scalar_lea.sflag [#allocation4], %s302_s15 }
  0xb8   : > { %p424_p12 = pnand %p893_p10, %p892_p7 }
  0xba   : > { %613 = dma.done.wait (!%p424_p12), %s303_s19, 16  }
  0xbb   : > { %615 = vsyncadd (!%p424_p12), %s303_s19, 4294967280  ;;  %s21_s14 = sadd.s32 1, %s638_s14   ;;  %s894_s9 = smov %s622_s10 }
  0xbc   : > { %p18_p9 = scmp.ge.s32.totalorder %s21_s14, 4   ;;  %s895_s10 = smov %s626_s11 }
  0xbd   : > { %s896_s11 = smov %s717_s23  ;;  %s897_s12 = smov %s634_s13 }
  0xbe   : > { %s898_s13 = smov %s900_s17  ;;  %20 = sbr.rel (!%p18_p9) target bundleno = 8 (0x8), region = 89 }
  0xc5   :  { %307 = vsyncpa [#allocation3], 1 }
  0xc6   :  { %309 = vsyncpa [#allocation3 + $0x1], 1 }
  0xc7   :  { %310 = vsyncpa [#allocation6], 1 }
  0xc8   :  { %312 = vsyncpa [#allocation6 + $0x1], 1 }
  0xc9   :  { %313 = vsyncpa [#allocation4], 1 }
  0xca   :  { %315 = vsyncpa [#allocation4 + $0x1], 1 }

</bundles_post_ra>
